<compile_context>
chip_gen: v7x
topology: tpu7x:2x2x1
jax: 0.10.0
libtpu: 0.0.40
codegen_flags: <defaults>
</compile_context>

<pallas_src>
import jax
import jax.numpy as jnp
from jax.experimental import pallas as pl
from jax.experimental.pallas import tpu as pltpu


def _round_up(x, m):
    return ((x + m - 1) // m) * m


# ---------------------------------------------------------------------------
# Kernels
# ---------------------------------------------------------------------------
def _linear_kernel_single_k(x_ref, w_ref, b_ref, o_ref):
    # One MXU pass over the full K; bias-add fused right after the dot.
    acc = jnp.dot(x_ref[...], w_ref[...], preferred_element_type=jnp.float32)
    o_ref[...] = (acc + b_ref[...].astype(jnp.float32)).astype(o_ref.dtype)


def _linear_kernel_ktiled_f32out(x_ref, w_ref, b_ref, o_ref):
    # f32 output: accumulate directly into the resident output block
    # (its BlockSpec index is k-invariant, so it stays in VMEM across k).
    k = pl.program_id(2)

    @pl.when(k == 0)
    def _():
        o_ref[...] = jnp.broadcast_to(b_ref[...].astype(jnp.float32),
                                      o_ref.shape)

    o_ref[...] += jnp.dot(x_ref[...], w_ref[...],
                          preferred_element_type=jnp.float32)


def _linear_kernel_ktiled_scratch(x_ref, w_ref, b_ref, o_ref, acc_ref):
    # Low-precision output (e.g. bf16): keep an f32 VMEM accumulator and
    # downcast once on the last K step.
    k = pl.program_id(2)

    @pl.when(k == 0)
    def _():
        acc_ref[...] = jnp.zeros_like(acc_ref)

    acc_ref[...] += jnp.dot(x_ref[...], w_ref[...],
                            preferred_element_type=jnp.float32)

    @pl.when(k == pl.num_programs(2) - 1)
    def _():
        o_ref[...] = (acc_ref[...] + b_ref[...].astype(jnp.float32)
                      ).astype(o_ref.dtype)


# ---------------------------------------------------------------------------
# Wrapper
# ---------------------------------------------------------------------------
def pallas_linear(x, w, b, *, tm=512, tn=512, tk_max=2048,
                  vmem_limit_bytes=32 * 1024 * 1024):
    """y = x @ w + b  where x: [..., K], w: [K, N] (pre-transposed), b: [N]."""
    orig_shape = x.shape
    K = orig_shape[-1]
    Kw, N = w.shape
    assert K == Kw, "weight first dim must match x's last dim"
    x2d = x.reshape(-1, K)
    M = x2d.shape[0]
    out_dtype = x.dtype
    b2d = b.reshape(1, N)

    # Clamp tiles to the sublane/lane-aligned problem size (keeps blocks
    # (8,128)-legal without padding the arrays).
    tm = min(tm, _round_up(M, 8))
    tn = min(tn, _round_up(N, 128))

    # v7x has 2 TensorCores sharded over the "parallel" grid axes: make sure
    # the (i, j) grid has at least 2 blocks when the problem allows it.
    if pl.cdiv(M, tm) * pl.cdiv(N, tn) == 1:
        if _round_up(M, 8) >= 16:
            tm = _round_up(pl.cdiv(M, 2), 8)
        elif _round_up(N, 128) >= 256:
            tn = _round_up(pl.cdiv(N, 2), 128)
    grid_m, grid_n = pl.cdiv(M, tm), pl.cdiv(N, tn)

    if K <= tk_max:
        # -------- fast path: single K step, no reduction axis, no padding ---
        out = pl.pallas_call(
            _linear_kernel_single_k,
            out_shape=jax.ShapeDtypeStruct((M, N), out_dtype),
            grid=(grid_m, grid_n),
            in_specs=[
                pl.BlockSpec((tm, K), lambda i, j: (i, 0)),   # x tile
                pl.BlockSpec((K, tn), lambda i, j: (0, j)),   # W tile
                pl.BlockSpec((1, tn), lambda i, j: (0, j)),   # bias tile
            ],
            out_specs=pl.BlockSpec((tm, tn), lambda i, j: (i, j)),
            compiler_params=pltpu.CompilerParams(
                dimension_semantics=("parallel", "parallel"),
                vmem_limit_bytes=vmem_limit_bytes,
            ),
        )(x2d, w, b2d)
    else:
        # -------- large-K path: K reduction axis; only K is zero-padded -----
        n_k = pl.cdiv(K, tk_max)
        tk = _round_up(pl.cdiv(K, n_k), 128)   # minimize K padding
        Kp = tk * n_k
        if Kp != K:
            x2d = jnp.pad(x2d, ((0, 0), (0, Kp - K)))
            # TODO(synk): in a real module, hoist this static-weight pad to
            # parameter-prep time so it is not redone every forward call.
            w = jnp.pad(w, ((0, Kp - K), (0, 0)))

        if out_dtype == jnp.float32:
            kernel, scratch = _linear_kernel_ktiled_f32out, []
        else:
            kernel = _linear_kernel_ktiled_scratch
            scratch = [pltpu.VMEM((tm, tn), jnp.float32)]

        out = pl.pallas_call(
            kernel,
            out_shape=jax.ShapeDtypeStruct((M, N), out_dtype),
            grid=(grid_m, grid_n, n_k),
            in_specs=[
                pl.BlockSpec((tm, tk), lambda i, j, k: (i, k)),   # x tile
                pl.BlockSpec((tk, tn), lambda i, j, k: (k, j)),   # W tile
                pl.BlockSpec((1, tn), lambda i, j, k: (0, j)),    # bias tile
            ],
            out_specs=pl.BlockSpec((tm, tn), lambda i, j, k: (i, j)),
            scratch_shapes=scratch,
            compiler_params=pltpu.CompilerParams(
                dimension_semantics=("parallel", "parallel", "arbitrary"),
                vmem_limit_bytes=vmem_limit_bytes,
            ),
        )(x2d, w, b2d)

    return out.reshape(*orig_shape[:-1], N)


if __name__ == "__main__":
    key = jax.random.PRNGKey(0)
    k1x, k1w, k1b, k2x, k2w, k2b = jax.random.split(key, 6)

    # --- test 1: module-consistent small shape (single-K fast path) --------
    d_res, d_sonar = 128, 256
    batch, seq = 2, 8
    bound = 1.0 / (d_res ** 0.5)
    w = jax.random.uniform(k1w, (d_res, d_sonar), jnp.float32, -bound, bound)
    b = jax.random.uniform(k1b, (d_sonar,), jnp.float32, -bound, bound)
    x = jax.random.normal(k1x, (batch, seq, d_res), jnp.float32)

    y = pallas_linear(x, w, b)
    jax.block_until_ready(y)
    y_ref = jnp.einsum("bsk,kn->bsn", x, w,
                       precision=jax.lax.Precision.HIGHEST) + b
    assert y.shape == (batch, seq, d_sonar)
    assert jnp.allclose(y, y_ref, atol=1e-3, rtol=1e-3)

    # --- test 2: force the K-reduction path (direct o_ref accumulation) ----
    d_res2, d_sonar2 = 640, 384
    batch2, seq2 = 2, 64
    bound2 = 1.0 / (d_res2 ** 0.5)
    w2 = jax.random.uniform(k2w, (d_res2, d_sonar2), jnp.float32,
                            -bound2, bound2)
    b2 = jax.random.uniform(k2b, (d_sonar2,), jnp.float32, -bound2, bound2)
    x2 = jax.random.normal(k2x, (batch2, seq2, d_res2), jnp.float32)

    y2 = pallas_linear(x2, w2, b2, tk_max=256)   # small tk_max -> K-tiled path
    jax.block_until_ready(y2)
    y2_ref = jnp.einsum("bsk,kn->bsn", x2, w2,
                        precision=jax.lax.Precision.HIGHEST) + b2
    assert y2.shape == (batch2, seq2, d_sonar2)
    assert jnp.allclose(y2, y2_ref, atol=1e-3, rtol=1e-3)

    print("KERNEL_OK")
</pallas_src>

<mosaic_0001>
module attributes {stable_mosaic.version = 11 : i64} {
  func.func @_linear_kernel_single_k(%arg0: i32, %arg1: i32, %arg2: memref<8x128xf32, #tpu.memory_space<vmem>>, %arg3: memref<128x256xf32, #tpu.memory_space<vmem>>, %arg4: memref<1x256xf32, #tpu.memory_space<vmem>>, %arg5: memref<8x256xf32, #tpu.memory_space<vmem>>) attributes {dimension_semantics = [#tpu.dimension_semantics<parallel>, #tpu.dimension_semantics<parallel>], iteration_bounds = array<i64: 2, 1>, scalar_prefetch = 0 : i64, scratch_operands = 0 : i64, tpu.core_type = #tpu.core_type<tc>, window_params = [{transform_indices = @transform_0, window_bounds = array<i64: 8, 128>}, {transform_indices = @transform_1, window_bounds = array<i64: 128, 256>}, {transform_indices = @transform_2, window_bounds = array<i64: 1, 256>}, {transform_indices = @transform_3, window_bounds = array<i64: 8, 256>}]} {
    %c0 = arith.constant 0 : index
    %c0_0 = arith.constant 0 : index
    %0 = vector.load %arg2[%c0, %c0_0] : memref<8x128xf32, #tpu.memory_space<vmem>>, vector<8x128xf32>
    %c0_1 = arith.constant 0 : index
    %c0_2 = arith.constant 0 : index
    %1 = vector.load %arg3[%c0_1, %c0_2] : memref<128x256xf32, #tpu.memory_space<vmem>>, vector<128x256xf32>
    %cst = arith.constant dense<0.000000e+00> : vector<8x256xf32>
    %2 = tpu.matmul %0, %1, %cst {dimension_numbers = #tpu.dot_dimension_numbers<[1], [0], [0], [1], [0, 0, 1, 1], [], []>} : vector<8x128xf32>, vector<128x256xf32>, vector<8x256xf32> -> vector<8x256xf32>
    %c0_3 = arith.constant 0 : index
    %c0_4 = arith.constant 0 : index
    %3 = vector.load %arg4[%c0_3, %c0_4] : memref<1x256xf32, #tpu.memory_space<vmem>>, vector<1x256xf32>
    %4 = vector.broadcast %3 : vector<1x256xf32> to vector<8x256xf32>
    %5 = arith.addf %2, %4 : vector<8x256xf32>
    %c0_5 = arith.constant 0 : index
    %c0_6 = arith.constant 0 : index
    %6 = vector.load %arg5[%c0_5, %c0_6] : memref<8x256xf32, #tpu.memory_space<vmem>>, vector<8x256xf32>
    tpu.vector_store %arg5[%c0_5, %c0_6], %5 {strides = array<i32>} : memref<8x256xf32, #tpu.memory_space<vmem>>, vector<8x256xf32>,
    return
  }
  func.func @transform_0(%arg0: i32, %arg1: i32) -> (i32, i32) {
    %c0_i32 = arith.constant 0 : i32
    %c0_i32_0 = arith.constant 0 : i32
    return %arg0, %c0_i32 : i32, i32
  }
  func.func @transform_1(%arg0: i32, %arg1: i32) -> (i32, i32) {
    %c0_i32 = arith.constant 0 : i32
    %c0_i32_0 = arith.constant 0 : i32
    return %c0_i32, %arg1 : i32, i32
  }
  func.func @transform_2(%arg0: i32, %arg1: i32) -> (i32, i32) {
    %c0_i32 = arith.constant 0 : i32
    %c0_i32_0 = arith.constant 0 : i32
    return %c0_i32, %arg1 : i32, i32
  }
  func.func @transform_3(%arg0: i32, %arg1: i32) -> (i32, i32) {
    %c0_i32 = arith.constant 0 : i32
    return %arg0, %arg1 : i32, i32
  }
}

</mosaic_0001>

<bundles_post_ra>
// kernel: tpu_custom_call.1
= control target key start
LH: loop header
LB: loop body
LE: loop exit
PB: predicated region body
PF: predicated region fallthrough
CT: control target
= control target key end

     0   :  { %8 = vsyncpa [#allocation3], 0  ;;  %s1003_s0 = inlined_call_operand.hbm [shape: f32[16,128], index: 0, kind: input, shape index: {}]   ;;  %s1004_s1 = inlined_call_operand.hbm [shape: f32[128,256], index: 1, kind: input, shape index: {}]   ;;  %s1005_s2 = inlined_call_operand.vmem [shape: f32[1,256], index: 2, kind: input, shape index: {}]   ;;  %s1006_s3 = inlined_call_operand.hbm [shape: f32[16,256], index: 3, kind: output, shape index: {}]  }
   0x1   :  { %10 = vsyncpa [#allocation3 + $0x1], 0 }
   0x2   :  { %11 = vsyncpa [#allocation6], 0 }
   0x3   :  { %12 = vsyncpa [#allocation4], 0 }
   0x4   :  { %14 = vsyncpa [#allocation4 + $0x1], 0  ;;  %s782_s12 = smov 0   ;;  %s784_s13 = smov 0  }
   0x5   :  { %s786_s14 = smov 0   ;;  %s788_s15 = smov 0  }
   0x6   :  { %s790_s16 = smov 0   ;;  %s792_s17 = smov 0  }
   0x7 LB: > { %s484_s18 = sadd.s32 4294967295, %s754_s17   ;;  %s485_s19 = sadd.s32 4294967294, %s754_s17   ;;  %s754_s17 = sphi %s792_s17, %s20_s17   ;;  %s750_s16 = sphi %s790_s16, %s1030_s16   ;;  %s746_s15 = sphi %s788_s15, %s1029_s15   ;;  %s742_s14 = sphi %s786_s14, %s1028_s14   ;;  %s738_s13 = sphi %s784_s13, %s1027_s13   ;;  %s734_s12 = sphi %s782_s12, %s1026_s12  }
   0x8   : > { %p52_p0 = scmp.ne.s32.totalorder %s738_s13, %s734_s12  ;;  %p816_p1 = scmp.eq.s32.totalorder %s484_s18, 0 }
   0x9   : > { %p820_p2 = scmp.eq.s32.totalorder %s484_s18, 1  ;;  %p136_p3 = scmp.eq.s32.totalorder %s485_s19, 1 }
   0xa   : > { %s1011_s20 = scalar_select %p816_p1, 1, 0 }
   0xb   : > { %s1012_s21 = scalar_select %p820_p2, 1, 0 }
   0xc   : > { %p826_p4 = por %p816_p1, %p52_p0  ;;  %p486_p5 = scmp.ge.s32.totalorder %s754_s17, 1 }
   0xd   : > { %p831_p6 = por %p136_p3, %p52_p0  ;;  %p143_p7 = scmp.lt.s32.totalorder %s754_s17, 3 }
   0xe   : > { %s1013_s22 = scalar_select %p826_p4, 1, 0 }
   0xf   : > { %s1014_s23 = scalar_select %p831_p6, 1, 0 }
  0x10   : > { %p836_p8 = pnand %p486_p5, %p143_p7  ;;  %s756_s25 = smov [#allocation5]  }
  0x11   : > { %s158_s26 = sshll.u32 %s756_s25, 4  ;;  %s32_s28 = sadd.s32 1, %s750_s16  ;;  %s159_s26 = int_to_ptr.vmem [resolvable:$true] %s158_s26 }
  0x12   : > { %s1015_s24 = scalar_select %p836_p8, 1, 0 }
  0x13   : > { %p542_p9 = pneg %p836_p8  ;;  %s610_s4 = scalar_lea.hbm %s1004_s1, 4096 }
  0x14   : > { %p611_p12 = scmp.ne.s32.totalorder %s1004_s1, %s610_s4  ;;  %p617_p5 = scmp.lt.u32.totalorder %s610_s4, %s1004_s1 }
  0x15   : > { %p845_p11 = pnand %p542_p9, %p816_p1 }
  0x17   : > { %p612_p13 = pneg %p845_p11 }
  0x19   : > { %p613_p0 = pnand %p612_p13, %p611_p12 }
  0x1b   : > { %p614_p3 = pneg %p613_p0 }
  0x1d   : > { %p619_p7 = pnand %p617_p5, %p614_p3 }
  0x1f   : > { %622 = shalt.err (!%p619_p7)
}
  0x20   : > { %s623_s9 = scalar_lea.vmem %s159_s26, 4096  ;;  %p631_p1 = scmp.lt.s32.totalorder %s159_s26, %s159_s26 }
  0x21   : > { %p624_p9 = scmp.ne.s32.totalorder %s159_s26, %s623_s9  ;;  %p632_p4 = scmp.lt.s32.totalorder %s623_s9, %s623_s9 }
  0x23   : > { %p626_p10 = pnand %p624_p9, %p612_p13  ;;  %p633_p8 = por %p632_p4, %p631_p1 }
  0x25   : > { %p627_p6 = pneg %p626_p10 }
  0x27   : > { %p634_p2 = pnand %p633_p8, %p627_p6 }
  0x29   : > { %637 = shalt.err (!%p634_p2)
}
  0x2a   : > { %s757_s10 = smov 256   ;;  %s758_s11 = smov 16  }
  0x2b   : > { %545 = dma.hbm_to_vmem [thread:$0]  (!%p845_p11), %s1004_s1, 4096, %s159_s26, [#allocation6], %s757_s10, %s757_s10, %s758_s11  }
  0x2c   : > { %p34_p1 = scmp.ge.s32.totalorder %s32_s28, 2  ;;  %s39_s25 = sadd.s32 1, %s742_s14 }
  0x2d   : > { %p46_p2 = scmp.ne.s32.totalorder %s742_s14, %s738_s13  ;;  %p47_p4 = scmp.eq.s32.totalorder %s754_s17, 0 }
  0x2e   : > { %s1032_s28 = smov (%p34_p1, %s32_s28), 0  ;;  %p1018_p8 = scmp.ne.s32.totalorder %s1012_s21, 0 }
  0x2f   : > { %p872_p6 = por %p47_p4, %p46_p2  ;;  %s36_s27 = ssub.s32 %s750_s16, %s1032_s28 }
  0x30   : > { %p878_p10 = por %p1018_p8, %p46_p2  ;;  %p555_p12 = scmp.lt.s32.totalorder %s754_s17, 2 }
  0x31   : > { %p37_p11 = scmp.eq.s32.totalorder %s36_s27, 0  ;;  %s180_s26 = sand.u32 1, %s742_s14  }
  0x32   : > { %s490_s4 = sshll.u32 %s180_s26, 3  ;;  %s491_s6 = sshll.u32 %s750_s16, 7 }
  0x33   : > { %s887_s5 = scalar_select %p37_p11, %s742_s14, %s39_s25  }
  0x34   : > { %s893_s9 = scalar_lea.hbm %s1003_s0, %s491_s6  ;;  %s184_s21 = scalar_lea.vmem [#allocation2], %s490_s4 }
  0x35   : > { %s191_s10 = sshll.u32 %s184_s21, 4  ;;  %p899_p13 = pnand %p555_p12, %p872_p6  ;;  %s895_s10 = int_to_ptr.vmem [resolvable:$true] %s191_s10 }
  0x36   : > { %s181_s18 = scalar_lea.sflag [#allocation3], %s180_s26  ;;  %s638_s19 = scalar_lea.hbm %s893_s9, 128 }
  0x37   : > { %p639_p0 = scmp.ne.s32.totalorder %s893_s9, %s638_s19  ;;  %p640_p3 = pneg %p899_p13 }
  0x38   : > { %s643_s4 = scalar_lea.hbm %s1003_s0, 256  ;;  %p644_p9 = scmp.lt.u32.totalorder %s893_s9, %s1003_s0 }
  0x39   : > { %p641_p5 = pnand %p640_p3, %p639_p0  ;;  %p645_p1 = scmp.lt.u32.totalorder %s643_s4, %s638_s19 }
  0x3a   : > { %p647_p4 = scmp.lt.u32.totalorder %s638_s19, %s893_s9 }
  0x3b   : > { %p642_p7 = pneg %p641_p5  ;;  %p646_p2 = por %p645_p1, %p644_p9 }
  0x3d   : > { %p648_p6 = por %p647_p4, %p646_p2 }
  0x3f   : > { %p649_p8 = pnand %p648_p6, %p642_p7 }
  0x41   : > { %652 = shalt.err (!%p649_p8)
}
  0x42   : > { %s653_s26 = scalar_lea.vmem %s895_s10, 128  ;;  %s759_s7 = smov [#allocation2]  }
  0x43   : > { %p654_p12 = scmp.ne.s32.totalorder %s895_s10, %s653_s26  ;;  %s658_s8 = sshll.u32 %s759_s7, 4  ;;  %s659_s8 = int_to_ptr.vmem [resolvable:$false] %s658_s8 }
  0x44   : > { %s660_s21 = scalar_lea.vmem %s659_s8, 256  ;;  %p661_p5 = scmp.lt.s32.totalorder %s895_s10, %s659_s8 }
  0x45   : > { %p656_p11 = pnand %p654_p12, %p640_p3  ;;  %p662_p9 = scmp.lt.s32.totalorder %s660_s21, %s653_s26 }
  0x47   : > { %p657_p0 = pneg %p656_p11  ;;  %p663_p1 = por %p662_p9, %p661_p5 }
  0x49   : > { %p664_p2 = pnand %p663_p1, %p657_p0 }
  0x4b   : > { %667 = shalt.err (!%p664_p2)
}
  0x4c   : > { %549 = dma.hbm_to_vmem [thread:$0]  (!%p899_p13), %s893_s9, 128, %s895_s10, %s181_s18  }
  0x4d   : > { %p1021_p7 = scmp.ne.s32.totalorder %s1015_s24, 0 }
  0x4e   : > { %s931_s19 = sand.u32 (!%p1021_p7), 1, %s738_s13   ;;  %p1022_p3 = scmp.ne.s32.totalorder (!%p1021_p7), %s1013_s22, 0 }
  0x4f   : > { %200 = sbr.rel (%p1021_p7) target bundleno = 354 (0x162), region = 32  ;;  %s493_s25 = sshll.u32 (!%p1021_p7), %s931_s19, 3 }
  0x50   : > { %s203_s27 = scalar_lea.sflag (!%p1021_p7), [#allocation3], %s931_s19  ;;  %s935_s4 = scalar_lea.vmem (!%p1021_p7), [#allocation2], %s493_s25 }
  0x56   : > { %721 = dma.done.wait (%p1022_p3), %s203_s27, 128  }
  0x57   : > { %723 = vsyncadd (%p1022_p3), %s203_s27, 4294967168  ;;  %p1023_p13 = scmp.ne.s32.totalorder %s1011_s20, 0 }
  0x59   : > { %725 = dma.done.wait (%p1023_p13), [#allocation6], 4096  }
  0x5a   : > { %727 = vsyncadd (%p1023_p13), [#allocation6], 4294963200  ;;  %v760_v0 = vmov 0.0   ;;  %v246_v1 = vld [vmem:[#allocation5 + $0x8] sm:$0xff]  ;;  %v248_v2 = vld [vmem:[#allocation5 + $0x18] sm:$0xff]  ;;  %v279_v50 = vlaneseq  ;;  %s495_s20 = sshll.u32 %s931_s19, 4 }
  0x5b   : > { %353 = vmatprep.mubr.f32.mxu0 %v760_v0  ;;  %v245_v3 = vld [vmem:[#allocation5] sm:$0xff]  ;;  %v502_v4 = vpack.c.bf16 %v248_v2, %v246_v1  ;;  %v247_v5 = vld [vmem:[#allocation5 + $0x10] sm:$0xff]  ;;  %v250_v6 = vld [vmem:[#allocation5 + $0x28] sm:$0xff]  ;;  %s501_s9 = sshll.u32 %s746_s15, 8  ;;  %s236_s10 = scalar_lea.vmem [#allocation7], %s495_s20 }
  0x5c   : > { %v252_v7 = vld [vmem:[#allocation5 + $0x38] sm:$0xff]  ;;  %v504_v8 = vpack.c.bf16 %v247_v5, %v245_v3  ;;  %v249_v10 = vld [vmem:[#allocation5 + $0x20] sm:$0xff]  ;;  %v251_v11 = vld [vmem:[#allocation5 + $0x30] sm:$0xff]  ;;  %v280_v51 = vshrl.u32 %v279_v50, 7  ;;  %s379_s11 = sshll.u32 %s236_s10, 4  ;;  %s954_s6 = scalar_lea.hbm %s1006_s3, %s501_s9  ;;  %s956_s11 = int_to_ptr.vmem [resolvable:$true] %s379_s11 }
  0x5d   : > { %v506_v9 = vpack.c.bf16 %v252_v7, %v250_v6  ;;  %v254_v12 = vld [vmem:[#allocation5 + $0x48] sm:$0xff]  ;;  %503 = vmatprep.subr.bf16.mxu0 %v502_v4  ;;  %v256_v13 = vld [vmem:[#allocation5 + $0x58] sm:$0xff]  ;;  %v508_v14 = vpack.c.bf16 %v251_v11, %v249_v10  ;;  %v253_v16 = vld [vmem:[#allocation5 + $0x40] sm:$0xff]  ;;  %s363_s26 = scalar_lea.sflag [#allocation4], %s931_s19  ;;  %s668_s15 = scalar_lea.vmem %s956_s11, 256 }
  0x5e   : > { %505 = vmatpush1.bf16.msra.mxu0 %v504_v8  ;;  %v510_v15 = vpack.c.bf16 %v256_v13, %v254_v12  ;;  %v255_v17 = vld [vmem:[#allocation5 + $0x50] sm:$0xff]  ;;  %v258_v18 = vld [vmem:[#allocation5 + $0x68] sm:$0xff]  ;;  %v260_v19 = vld [vmem:[#allocation5 + $0x78] sm:$0xff]  ;;  %v281_v52 = vsub.s32 0, %v280_v51  ;;  %v285_v54 = vsub.s32 1, %v280_v51  ;;  %p669_p4 = scmp.ne.s32.totalorder %s956_s11, %s668_s15  ;;  %s761_s7 = smov [#allocation7]  }
  0x5f   : > { %507 = vmatprep.subr.bf16.mxu0 %v506_v9  ;;  %v512_v20 = vpack.c.bf16 %v255_v17, %v253_v16  ;;  %v514_v21 = vpack.c.bf16 %v260_v19, %v258_v18  ;;  %v257_v22 = vld [vmem:[#allocation5 + $0x60] sm:$0xff]  ;;  %v259_v23 = vld [vmem:[#allocation5 + $0x70] sm:$0xff]  ;;  %v262_v24 = vld [vmem:[#allocation5 + $0x88] sm:$0xff]  ;;  %s672_s8 = sshll.u32 %s761_s7, 4  ;;  %s673_s8 = int_to_ptr.vmem [resolvable:$false] %s672_s8 }
  0x60   : > { %v264_v25 = vld [vmem:[#allocation5 + $0x98] sm:$0xff]  ;;  %v516_v26 = vpack.c.bf16 %v259_v23, %v257_v22  ;;  %v261_v28 = vld [vmem:[#allocation5 + $0x80] sm:$0xff]  ;;  %v263_v29 = vld [vmem:[#allocation5 + $0x90] sm:$0xff]  ;;  %p670_p6 = pnand %p669_p4, %p878_p10  ;;  %s674_s21 = scalar_lea.vmem %s673_s8, 512 }
  0x61   : > { %v518_v27 = vpack.c.bf16 %v264_v25, %v262_v24  ;;  %v266_v30 = vld [vmem:[#allocation5 + $0xa8] sm:$0xff]  ;;  %v268_v31 = vld [vmem:[#allocation5 + $0xb8] sm:$0xff]  ;;  %v520_v32 = vpack.c.bf16 %v263_v29, %v261_v28  ;;  %v265_v34 = vld [vmem:[#allocation5 + $0xa0] sm:$0xff]  ;;  %p675_p12 = scmp.lt.s32.totalorder %s956_s11, %s673_s8  ;;  %p676_p11 = scmp.lt.s32.totalorder %s674_s21, %s668_s15 }
  0x62   : > { %509 = vmatpush1.bf16.msra.mxu0 %v508_v14  ;;  %v522_v33 = vpack.c.bf16 %v268_v31, %v266_v30  ;;  %v267_v35 = vld [vmem:[#allocation5 + $0xb0] sm:$0xff]  ;;  %v270_v36 = vld [vmem:[#allocation5 + $0xc8] sm:$0xff]  ;;  %v272_v37 = vld [vmem:[#allocation5 + $0xd8] sm:$0xff]  ;;  %p671_p8 = pneg %p670_p6 }
  0x63   : > { %511 = vmatprep.subr.bf16.mxu0 %v510_v15  ;;  %v524_v38 = vpack.c.bf16 %v267_v35, %v265_v34  ;;  %v526_v39 = vpack.c.bf16 %v272_v37, %v270_v36  ;;  %v269_v40 = vld [vmem:[#allocation5 + $0xc0] sm:$0xff]  ;;  %v271_v41 = vld [vmem:[#allocation5 + $0xd0] sm:$0xff]  ;;  %v274_v42 = vld [vmem:[#allocation5 + $0xe8] sm:$0xff]  ;;  %p677_p0 = por %p676_p11, %p675_p12 }
  0x64   : > { %v276_v43 = vld [vmem:[#allocation5 + $0xf8] sm:$0xff]  ;;  %v528_v44 = vpack.c.bf16 %v271_v41, %v269_v40  ;;  %v273_v46 = vld [vmem:[#allocation5 + $0xe0] sm:$0xff]  ;;  %v275_v47 = vld [vmem:[#allocation5 + $0xf0] sm:$0xff] }
  0x65   : > { %v530_v45 = vpack.c.bf16 %v276_v43, %v274_v42  ;;  %v532_v48 = vpack.c.bf16 %v275_v47, %v273_v46  ;;  %v244_v49 = vld [vmem:[%s935_s4] sm:$0xff]  ;;  %p678_p5 = pnand %p677_p0, %p671_p8 }
  0x66   : > { %513 = vmatpush1.bf16.msra.mxu0 %v512_v20  ;;  %v277_v53 = vld [vmem:[%s1005_s2] sm:$0x3] }
  0x67   : > { %515 = vmatprep.subr.bf16.mxu0 %v514_v21  ;;  %v282_v55 = vrot.slane %v277_v53, %v281_v52  ;;  %v286_v56 = vrot.slane %v277_v53, %v285_v54 }
  0x6a   : > { %517 = vmatpush1.bf16.msra.mxu0 %v516_v26 }
  0x6b   : > { %519 = vmatprep.subr.bf16.mxu0 %v518_v27 }
  0x6e   : > { %521 = vmatpush1.bf16.msra.mxu0 %v520_v32 }
  0x6f   : > { %523 = vmatprep.subr.bf16.mxu0 %v522_v33 }
  0x72   : > { %525 = vmatpush1.bf16.msra.mxu0 %v524_v38 }
  0x73   : > { %527 = vmatprep.subr.bf16.mxu0 %v526_v39 }
  0x76   : > { %529 = vmatpush1.bf16.msra.mxu0 %v528_v44 }
  0x77   : > { %531 = vmatprep.subr.bf16.mxu0 %v530_v45 }
  0x7a   : > { %533 = vmatpush1.bf16.msra.mxu0 %v532_v48 }
  0x7d   : > { %354 = vmatmul.mubr.f32.vlgmr.msra.gmra.mrb[0].mxu0 %v244_v49 }
 0x150   : > { %v355_v57 = vpop.f32.mrb[0].mxu0 }
 0x151   : > { %v356_v58 = vadd.f32 %v355_v57, %v282_v55  ;;  %v357_v59 = vpop.f32.mrb[1].mxu0 }
 0x152   : > { %v358_v60 = vadd.f32 %v357_v59, %v286_v56 }
 0x153   : > { %360 = vst [vmem:[%s236_s10] sm:$0xff] %v356_v58 }
 0x154   : > { %361 = vst [vmem:[%s236_s10 + $0x8] sm:$0xff] %v358_v60 }
 0x155   : > { %681 = shalt.err (!%p678_p5)
}
 0x156   : > { %s682_s19 = scalar_lea.hbm %s954_s6, 256  ;;  %s686_s4 = scalar_lea.hbm %s1006_s3, 512 }
 0x157   : > { %p683_p9 = scmp.ne.s32.totalorder %s954_s6, %s682_s19  ;;  %p687_p7 = scmp.lt.u32.totalorder %s954_s6, %s1006_s3 }
 0x158   : > { %p688_p3 = scmp.lt.u32.totalorder %s686_s4, %s682_s19  ;;  %p690_p4 = scmp.lt.u32.totalorder %s682_s19, %s954_s6 }
 0x159   : > { %p684_p1 = pnand %p683_p9, %p878_p10 }
 0x15a   : > { %p689_p13 = por %p688_p3, %p687_p7 }
 0x15b   : > { %p685_p2 = pneg %p684_p1 }
 0x15c   : > { %p691_p6 = por %p690_p4, %p689_p13 }
 0x15e   : > { %p692_p8 = pnand %p691_p6, %p685_p2 }
 0x160   : > { %695 = shalt.err (!%p692_p8)
}
 0x161   : > { %540 = dma.vmem_to_hbm [thread:$0]  (%p878_p10), %s956_s11, 256, %s954_s6, %s363_s26  }
 0x162 PF: > { %s391_s24 = sand.u32 1, %s734_s12   ;;  %p1024_p12 = scmp.ne.s32.totalorder %s1014_s23, 0 }
 0x163   : > { %p1025_p11 = scmp.ge.s32.totalorder %s754_s17, 2  ;;  %s392_s9 = scalar_lea.sflag [#allocation4], %s391_s24 }
 0x165   : > { %p551_p0 = pnand %p1025_p11, %p1024_p12 }
 0x167   : > { %729 = dma.done.wait (!%p551_p0), %s392_s9, 256  }
 0x168   : > { %731 = vsyncadd (!%p551_p0), %s392_s9, 4294967040  ;;  %s20_s17 = sadd.s32 1, %s754_s17   ;;  %s1026_s12 = smov %s738_s13 }
 0x169   : > { %p17_p5 = scmp.ge.s32.totalorder %s20_s17, 4   ;;  %s1027_s13 = smov %s742_s14 }
 0x16a   : > { %s1028_s14 = smov %s887_s5  ;;  %s1029_s15 = smov %s750_s16 }
 0x16b   : > { %s1030_s16 = smov %s1032_s28  ;;  %19 = sbr.rel (!%p17_p5) target bundleno = 7 (0x7), region = 85 }
 0x172   :  { %397 = vsyncpa [#allocation3], 1 }
 0x173   :  { %399 = vsyncpa [#allocation3 + $0x1], 1 }
 0x174   :  { %400 = vsyncpa [#allocation6], 1 }
 0x175   :  { %401 = vsyncpa [#allocation4], 1 }
 0x176   :  { %403 = vsyncpa [#allocation4 + $0x1], 1 }

</bundles_post_ra>
